<compile_context>
chip_gen: v7x
topology: tpu7x:2x2x1
jax: 0.10.0
libtpu: 0.0.40
codegen_flags: <defaults>
</compile_context>

<pallas_src>
import jax
import jax.numpy as jnp
from jax.experimental import pallas as pl
from jax.experimental.pallas import tpu as pltpu


def _linear_head_kernel(x_ref, w_ref, b_ref, o_ref):
    # In-kernel bf16 cast of the activations (VPU work, hidden under DMA),
    # single MXU matmul with f32 accumulation, f32 bias epilogue.
    x_bf16 = x_ref[...].astype(jnp.bfloat16)
    acc = jnp.dot(x_bf16, w_ref[...], preferred_element_type=jnp.float32)
    o_ref[...] = acc + b_ref[...]


def prepare_linear_head_params(weight, bias):
    """One-time (init-time) parameter transform. NOT part of the hot path.

    weight: (num_classes, input_dim) f32, PyTorch nn.Linear layout
    bias:   (num_classes,)           f32
    Returns:
      w_prepped: (input_dim, num_classes) bf16, pre-transposed, compact
      b_prepped: (1, num_classes)         f32
    """
    w_prepped = weight.T.astype(jnp.bfloat16)
    b_prepped = bias.astype(jnp.float32).reshape(1, -1)
    return w_prepped, b_prepped


@jax.jit
def linear_head(x, w_prepped, b_prepped):
    """y = x @ weight.T + bias  (PyTorch nn.Linear forward semantics).

    x:         (B, input_dim)           f32
    w_prepped: (input_dim, num_classes) bf16  (from prepare_linear_head_params)
    b_prepped: (1, num_classes)         f32
    returns    (B, num_classes)         f32
    """
    b, input_dim = x.shape
    _, num_classes = w_prepped.shape

    cost = pl.CostEstimate(
        flops=2 * b * input_dim * num_classes,
        transcendentals=0,
        bytes_accessed=(x.size * 4              # f32 activations in
                        + w_prepped.size * 2    # bf16 compact weight in
                        + b_prepped.size * 4    # f32 bias in
                        + b * num_classes * 4), # f32 logits out
    )

    # Gridless call: every operand is a full-array block resident in VMEM,
    # so there is no pipeline bookkeeping and no double-buffering to pay for.
    return pl.pallas_call(
        _linear_head_kernel,
        out_shape=jax.ShapeDtypeStruct((b, num_classes), jnp.float32),
        in_specs=[
            pl.BlockSpec(memory_space=pltpu.MemorySpace.VMEM),
            pl.BlockSpec(memory_space=pltpu.MemorySpace.VMEM),
            pl.BlockSpec(memory_space=pltpu.MemorySpace.VMEM),
        ],
        out_specs=pl.BlockSpec(memory_space=pltpu.MemorySpace.VMEM),
        cost_estimate=cost,
    )(x, w_prepped, b_prepped)


if __name__ == "__main__":
    # Module defaults: input_dim=1568, num_classes=10. Small batch for demo.
    batch = 8
    input_dim = 1568
    num_classes = 10

    key = jax.random.PRNGKey(0)
    kx, kw, kb = jax.random.split(key, 3)

    # Deterministic params mimicking nn.Linear's U(-1/sqrt(fan_in), 1/sqrt(fan_in)).
    bound = 1.0 / (input_dim ** 0.5)
    weight = jax.random.uniform(kw, (num_classes, input_dim),
                                minval=-bound, maxval=bound, dtype=jnp.float32)
    bias = jax.random.uniform(kb, (num_classes,),
                              minval=-bound, maxval=bound, dtype=jnp.float32)
    x = jax.random.normal(kx, (batch, input_dim), dtype=jnp.float32)

    # Init-time parameter transform (done once, reused for every forward).
    w_prepped, b_prepped = prepare_linear_head_params(weight, bias)

    y = linear_head(x, w_prepped, b_prepped)
    y = jax.block_until_ready(y)

    # Pure-JAX f32 reference (PyTorch nn.Linear forward). Tolerance loosened
    # for the bf16 MXU inputs; accumulation/bias are f32 in the kernel.
    y_ref = x @ weight.T + bias
    assert y.shape == (batch, num_classes)
    assert jnp.allclose(y, y_ref, atol=3e-2, rtol=3e-2), \
        f"max abs diff {jnp.max(jnp.abs(y - y_ref))}"

    print("KERNEL_OK")
</pallas_src>

<mosaic_0001>
module attributes {stable_mosaic.version = 11 : i64} {
  func.func @_linear_head_kernel(%arg0: memref<8x1568xf32, #tpu.memory_space<vmem>>, %arg1: memref<1568x10xbf16, #tpu.memory_space<vmem>>, %arg2: memref<1x10xf32, #tpu.memory_space<vmem>>, %arg3: memref<8x10xf32, #tpu.memory_space<vmem>>) attributes {dimension_semantics = [], scalar_prefetch = 0 : i64, scratch_operands = 0 : i64, tpu.core_type = #tpu.core_type<tc>} {
    %c0 = arith.constant 0 : index
    %c0_0 = arith.constant 0 : index
    %0 = vector.load %arg0[%c0, %c0_0] : memref<8x1568xf32, #tpu.memory_space<vmem>>, vector<8x1568xf32>
    %1 = arith.truncf %0 : vector<8x1568xf32> to vector<8x1568xbf16>
    %c0_1 = arith.constant 0 : index
    %c0_2 = arith.constant 0 : index
    %2 = vector.load %arg1[%c0_1, %c0_2] : memref<1568x10xbf16, #tpu.memory_space<vmem>>, vector<1568x10xbf16>
    %cst = arith.constant dense<0.000000e+00> : vector<8x10xf32>
    %3 = tpu.matmul %1, %2, %cst {dimension_numbers = #tpu.dot_dimension_numbers<[1], [0], [0], [1], [0, 0, 1, 1], [], []>} : vector<8x1568xbf16>, vector<1568x10xbf16>, vector<8x10xf32> -> vector<8x10xf32>
    %c0_3 = arith.constant 0 : index
    %c0_4 = arith.constant 0 : index
    %4 = vector.load %arg2[%c0_3, %c0_4] : memref<1x10xf32, #tpu.memory_space<vmem>>, vector<1x10xf32>
    %5 = vector.broadcast %4 : vector<1x10xf32> to vector<8x10xf32>
    %6 = arith.addf %3, %5 : vector<8x10xf32>
    %c0_5 = arith.constant 0 : index
    %c0_6 = arith.constant 0 : index
    %7 = vector.load %arg3[%c0_5, %c0_6] : memref<8x10xf32, #tpu.memory_space<vmem>>, vector<8x10xf32>
    tpu.vector_store %arg3[%c0_5, %c0_6], %6 {strides = array<i32>} : memref<8x10xf32, #tpu.memory_space<vmem>>, vector<8x10xf32>,
    return
  }
}

</mosaic_0001>

<bundles_post_ra>
// kernel: linear_head.1
= control target key start
LH: loop header
LB: loop body
LE: loop exit
PB: predicated region body
PF: predicated region fallthrough
CT: control target
= control target key end

     0   :  { %s1872_s0 = inlined_call_operand.vmem [shape: f32[8,1568], index: 0, kind: input, shape index: {}]   ;;  %s1873_s1 = inlined_call_operand.vmem [shape: bf16[1568,10], index: 1, kind: input, shape index: {}]   ;;  %s1874_s2 = inlined_call_operand.vmem [shape: f32[1,10], index: 2, kind: input, shape index: {}]   ;;  %s1875_s3 = inlined_call_operand.hbm [shape: f32[8,10], index: 3, kind: output, shape index: {}]  }
   0x1   :  { %v1379_v0 = vld [vmem:[%s1873_s1 + $0x40] sm:$0xff]   ;;  %v1383_v4 = vld [vmem:[%s1873_s1 + $0x48] sm:$0xff]   ;;  %v1387_v8 = vld [vmem:[%s1873_s1 + $0x50] sm:$0xff]  }
   0x2   :  { %v1380_v1 = vld [vmem:[%s1873_s1] sm:$0xff]   ;;  %1233 = vmatprep.subr.bf16.mxu0 %v1379_v0  ;;  %v1384_v5 = vld [vmem:[%s1873_s1 + $0x8] sm:$0xff]   ;;  %v1388_v9 = vld [vmem:[%s1873_s1 + $0x10] sm:$0xff]  }
   0x3   :  { %v1381_v2 = vld [vmem:[%s1873_s1 + $0xc0] sm:$0xff]   ;;  %1234 = vmatpush3.bf16.msra.mxu0 %v1380_v1  ;;  %v1385_v6 = vld [vmem:[%s1873_s1 + $0xc8] sm:$0xff]   ;;  %v1389_v10 = vld [vmem:[%s1873_s1 + $0xd0] sm:$0xff]  }
   0x4   :  { %v1382_v3 = vld [vmem:[%s1873_s1 + $0x80] sm:$0xff]   ;;  %1255 = vmatprep.subr.bf16.mxu1 %v1381_v2  ;;  %1235 = vmatprep.subr.bf16.mxu0 %v1383_v4  ;;  %v1386_v7 = vld [vmem:[%s1873_s1 + $0x88] sm:$0xff]   ;;  %v1390_v11 = vld [vmem:[%s1873_s1 + $0x90] sm:$0xff]  }
   0x5   :  { %1256 = vmatpush3.bf16.msra.mxu1 %v1382_v3  ;;  %v1391_v12 = vld [vmem:[%s1873_s1 + $0x58] sm:$0xff]   ;;  %v1395_v16 = vld [vmem:[%s1873_s1 + $0x60] sm:$0xff]   ;;  %v1399_v20 = vld [vmem:[%s1873_s1 + $0x68] sm:$0xff]  }
   0x6   :  { %1257 = vmatprep.subr.bf16.mxu1 %v1385_v6  ;;  %v1392_v13 = vld [vmem:[%s1873_s1 + $0x18] sm:$0xff]   ;;  %v1396_v17 = vld [vmem:[%s1873_s1 + $0x20] sm:$0xff]   ;;  %v1400_v21 = vld [vmem:[%s1873_s1 + $0x28] sm:$0xff]  }
   0x7   :  { %1236 = vmatpush3.bf16.msra.mxu0 %v1384_v5  ;;  %v1393_v14 = vld [vmem:[%s1873_s1 + $0xd8] sm:$0xff]   ;;  %v1397_v18 = vld [vmem:[%s1873_s1 + $0xe0] sm:$0xff]   ;;  %v1401_v22 = vld [vmem:[%s1873_s1 + $0xe8] sm:$0xff]  }
   0x8   :  { %1237 = vmatprep.subr.bf16.mxu0 %v1387_v8  ;;  %v1394_v15 = vld [vmem:[%s1873_s1 + $0x98] sm:$0xff]   ;;  %v1398_v19 = vld [vmem:[%s1873_s1 + $0xa0] sm:$0xff]   ;;  %v1402_v23 = vld [vmem:[%s1873_s1 + $0xa8] sm:$0xff]  }
   0x9   :  { %1258 = vmatpush3.bf16.msra.mxu1 %v1386_v7  ;;  %v1403_v24 = vld [vmem:[%s1873_s1 + $0x70] sm:$0xff]   ;;  %v1407_v28 = vld [vmem:[%s1873_s1 + $0x78] sm:$0xff]   ;;  %v17_v32 = vld [vmem:[%s1872_s0 + $0x8] sm:$0xff] }
   0xa   :  { %1259 = vmatprep.subr.bf16.mxu1 %v1389_v10  ;;  %v1404_v25 = vld [vmem:[%s1873_s1 + $0x30] sm:$0xff]   ;;  %v1408_v29 = vld [vmem:[%s1873_s1 + $0x38] sm:$0xff]   ;;  %v16_v33 = vld [vmem:[%s1872_s0] sm:$0xff]  ;;  %v30_v34 = vpack.c.bf16 %v17_v32, %v17_v32 }
   0xb   :  { %1238 = vmatpush3.bf16.msra.mxu0 %v1388_v9  ;;  %v1405_v26 = vld [vmem:[%s1873_s1 + $0xf0] sm:$0xff]   ;;  %v1409_v30 = vld [vmem:[%s1873_s1 + $0xf8] sm:$0xff]   ;;  %v29_v35 = vpack.c.bf16 %v16_v33, %v16_v33  ;;  %v1411_v36 = vld [vmem:[%s1873_s1 + $0x140] sm:$0xff]  }
   0xc   :  { %1239 = vmatprep.subr.bf16.mxu0 %v1391_v12  ;;  %v1406_v27 = vld [vmem:[%s1873_s1 + $0xb0] sm:$0xff]   ;;  %v1410_v31 = vld [vmem:[%s1873_s1 + $0xb8] sm:$0xff]   ;;  %v1412_v39 = vld [vmem:[%s1873_s1 + $0x100] sm:$0xff]   ;;  %869 = vmatprep.mubr.bf16.mxu0 %v30_v34 }
   0xd   :  { %1260 = vmatpush3.bf16.msra.mxu1 %v1390_v11  ;;  %v19_v37 = vld [vmem:[%s1872_s0 + $0x18] sm:$0xff]  ;;  %v1413_v40 = vld [vmem:[%s1873_s1 + $0x1c0] sm:$0xff]   ;;  %v18_v41 = vld [vmem:[%s1872_s0 + $0x10] sm:$0xff] }
   0xe   :  { %1261 = vmatprep.subr.bf16.mxu1 %v1393_v14  ;;  %v32_v38 = vpack.c.bf16 %v19_v37, %v19_v37  ;;  %v31_v42 = vpack.c.bf16 %v18_v41, %v18_v41  ;;  %v1414_v43 = vld [vmem:[%s1873_s1 + $0x180] sm:$0xff]   ;;  %v1415_v44 = vld [vmem:[%s1873_s1 + $0x148] sm:$0xff]   ;;  %v1419_v48 = vld [vmem:[%s1873_s1 + $0x150] sm:$0xff]  }
   0xf   :  { %1240 = vmatpush3.bf16.msra.mxu0 %v1392_v13  ;;  %v1416_v45 = vld [vmem:[%s1873_s1 + $0x108] sm:$0xff]   ;;  %v1420_v49 = vld [vmem:[%s1873_s1 + $0x110] sm:$0xff]   ;;  %v1423_v52 = vld [vmem:[%s1873_s1 + $0x158] sm:$0xff]  }
  0x10   :  { %1241 = vmatprep.subr.bf16.mxu0 %v1395_v16  ;;  %909 = vmatprep.mubr.bf16.mxu1 %v32_v38  ;;  %v1417_v46 = vld [vmem:[%s1873_s1 + $0x1c8] sm:$0xff]   ;;  %v1421_v50 = vld [vmem:[%s1873_s1 + $0x1d0] sm:$0xff]   ;;  %v1424_v53 = vld [vmem:[%s1873_s1 + $0x118] sm:$0xff]  }
  0x11   :  { %1262 = vmatpush3.bf16.msra.mxu1 %v1394_v15  ;;  %v1418_v47 = vld [vmem:[%s1873_s1 + $0x188] sm:$0xff]   ;;  %v1422_v51 = vld [vmem:[%s1873_s1 + $0x190] sm:$0xff]   ;;  %v1425_v54 = vld [vmem:[%s1873_s1 + $0x1d8] sm:$0xff]  }
  0x12   :  { %1263 = vmatprep.subr.bf16.mxu1 %v1397_v18  ;;  %v1426_v55 = vld [vmem:[%s1873_s1 + $0x198] sm:$0xff]   ;;  %v1427_v56 = vld [vmem:[%s1873_s1 + $0x160] sm:$0xff]   ;;  %v1431_v60 = vld [vmem:[%s1873_s1 + $0x168] sm:$0xff]  }
  0x13   :  { %1242 = vmatpush3.bf16.msra.mxu0 %v1396_v17  ;;  %v1428_v57 = vld [vmem:[%s1873_s1 + $0x120] sm:$0xff]   ;;  %v1432_v61 = vld [vmem:[%s1873_s1 + $0x128] sm:$0xff]   ;;  %v1435_v0 = vld [vmem:[%s1873_s1 + $0x170] sm:$0xff]  }
  0x14   :  { %1243 = vmatprep.subr.bf16.mxu0 %v1399_v20  ;;  %v1429_v58 = vld [vmem:[%s1873_s1 + $0x1e0] sm:$0xff]   ;;  %v1433_v62 = vld [vmem:[%s1873_s1 + $0x1e8] sm:$0xff]   ;;  %v1436_v1 = vld [vmem:[%s1873_s1 + $0x130] sm:$0xff]  }
  0x15   :  { %1264 = vmatpush3.bf16.msra.mxu1 %v1398_v19  ;;  %v1430_v59 = vld [vmem:[%s1873_s1 + $0x1a0] sm:$0xff]   ;;  %v1434_v63 = vld [vmem:[%s1873_s1 + $0x1a8] sm:$0xff]   ;;  %v1437_v2 = vld [vmem:[%s1873_s1 + $0x1f0] sm:$0xff]  }
  0x16   :  { %1265 = vmatprep.subr.bf16.mxu1 %v1401_v22  ;;  %v1438_v3 = vld [vmem:[%s1873_s1 + $0x1b0] sm:$0xff]   ;;  %v1439_v4 = vld [vmem:[%s1873_s1 + $0x178] sm:$0xff]   ;;  %v21_v8 = vld [vmem:[%s1872_s0 + $0x28] sm:$0xff] }
  0x17   :  { %1244 = vmatpush3.bf16.msra.mxu0 %v1400_v21  ;;  %v1440_v5 = vld [vmem:[%s1873_s1 + $0x138] sm:$0xff]   ;;  %v20_v9 = vld [vmem:[%s1872_s0 + $0x20] sm:$0xff]  ;;  %v34_v10 = vpack.c.bf16 %v21_v8, %v21_v8  ;;  %v22_v17 = vld [vmem:[%s1872_s0 + $0x30] sm:$0xff] }
  0x18   :  { %1245 = vmatprep.subr.bf16.mxu0 %v1403_v24  ;;  %v1441_v6 = vld [vmem:[%s1873_s1 + $0x1f8] sm:$0xff]   ;;  %v33_v11 = vpack.c.bf16 %v20_v9, %v20_v9  ;;  %v1443_v12 = vld [vmem:[%s1873_s1 + $0x240] sm:$0xff]   ;;  %v35_v18 = vpack.c.bf16 %v22_v17, %v22_v17  ;;  %v1447_v20 = vld [vmem:[%s1873_s1 + $0x248] sm:$0xff]  }
  0x19   :  { %1266 = vmatpush3.bf16.msra.mxu1 %v1402_v23  ;;  %v1442_v7 = vld [vmem:[%s1873_s1 + $0x1b8] sm:$0xff]   ;;  %v1444_v15 = vld [vmem:[%s1873_s1 + $0x200] sm:$0xff]   ;;  %v1448_v21 = vld [vmem:[%s1873_s1 + $0x208] sm:$0xff]  }
  0x1a   :  { %1267 = vmatprep.subr.bf16.mxu1 %v1405_v26  ;;  %v23_v13 = vld [vmem:[%s1872_s0 + $0x38] sm:$0xff]  ;;  %v1445_v16 = vld [vmem:[%s1873_s1 + $0x2c0] sm:$0xff]   ;;  %v1449_v22 = vld [vmem:[%s1873_s1 + $0x2c8] sm:$0xff]  }
  0x1b   :  { %1246 = vmatpush3.bf16.msra.mxu0 %v1404_v25  ;;  %v36_v14 = vpack.c.bf16 %v23_v13, %v23_v13  ;;  %v1446_v19 = vld [vmem:[%s1873_s1 + $0x280] sm:$0xff]   ;;  %v1450_v23 = vld [vmem:[%s1873_s1 + $0x288] sm:$0xff]   ;;  %v1451_v24 = vld [vmem:[%s1873_s1 + $0x250] sm:$0xff]  }
  0x1c   :  { %1247 = vmatprep.subr.bf16.mxu0 %v1407_v28  ;;  %v1452_v25 = vld [vmem:[%s1873_s1 + $0x210] sm:$0xff]   ;;  %v1455_v28 = vld [vmem:[%s1873_s1 + $0x258] sm:$0xff]   ;;  %v1459_v32 = vld [vmem:[%s1873_s1 + $0x260] sm:$0xff]  }
  0x1d   :  { %1268 = vmatpush3.bf16.msra.mxu1 %v1406_v27  ;;  %v1453_v26 = vld [vmem:[%s1873_s1 + $0x2d0] sm:$0xff]   ;;  %v1460_v33 = vld [vmem:[%s1873_s1 + $0x220] sm:$0xff]   ;;  %v1464_v37 = vld [vmem:[%s1873_s1 + $0x228] sm:$0xff]  }
  0x1e   :  { %1269 = vmatprep.subr.bf16.mxu1 %v1409_v30  ;;  %v1454_v27 = vld [vmem:[%s1873_s1 + $0x290] sm:$0xff]   ;;  %v1457_v30 = vld [vmem:[%s1873_s1 + $0x2d8] sm:$0xff]   ;;  %v1461_v34 = vld [vmem:[%s1873_s1 + $0x2e0] sm:$0xff]  }
  0x1f   :  { %1248 = vmatpush3.bf16.msra.mxu0 %v1408_v29  ;;  %v1456_v29 = vld [vmem:[%s1873_s1 + $0x218] sm:$0xff]   ;;  %v1465_v38 = vld [vmem:[%s1873_s1 + $0x2e8] sm:$0xff]   ;;  %v1468_v41 = vld [vmem:[%s1873_s1 + $0x230] sm:$0xff]  }
  0x20   :  { %1277 = vmatprep.subr.bf16.mxu0 %v1411_v36  ;;  %v1463_v36 = vld [vmem:[%s1873_s1 + $0x268] sm:$0xff]  }
  0x21   :  { %1270 = vmatpush3.bf16.msra.mxu1 %v1410_v31  ;;  %v1458_v31 = vld [vmem:[%s1873_s1 + $0x298] sm:$0xff]  }
  0x22   :  { %870 = vmatmul.mubr.bf16.vlgmr.msra.gmra.mrb[0].mxu0 %v29_v35  ;;  %1299 = vmatprep.subr.bf16.mxu1 %v1413_v40  ;;  %v1462_v35 = vld [vmem:[%s1873_s1 + $0x2a0] sm:$0xff]   ;;  %v1467_v40 = vld [vmem:[%s1873_s1 + $0x270] sm:$0xff]  }
  0x23   :  { %1278 = vmatpush3.bf16.msra.mxu0 %v1412_v39  ;;  %949 = vmatprep.mubr.bf16.mxu0 %v34_v10  ;;  %v1466_v39 = vld [vmem:[%s1873_s1 + $0x2a8] sm:$0xff]  }
  0x24   :  { %910 = vmatmul.mubr.bf16.vlgmr.msra.gmra.mrb[0].mxu1 %v31_v42  ;;  %1279 = vmatprep.subr.bf16.mxu0 %v1415_v44  ;;  %v1469_v42 = vld [vmem:[%s1873_s1 + $0x2f0] sm:$0xff]   ;;  %v1471_v44 = vld [vmem:[%s1873_s1 + $0x278] sm:$0xff]  }
  0x25   :  { %1300 = vmatpush3.bf16.msra.mxu1 %v1414_v43  ;;  %989 = vmatprep.mubr.bf16.mxu1 %v36_v14  ;;  %v1470_v43 = vld [vmem:[%s1873_s1 + $0x2b0] sm:$0xff]  }
  0x26   :  { %1301 = vmatprep.subr.bf16.mxu1 %v1417_v46  ;;  %v1473_v46 = vld [vmem:[%s1873_s1 + $0x2f8] sm:$0xff]  }
  0x27   :  { %1280 = vmatpush3.bf16.msra.mxu0 %v1416_v45  ;;  %v1472_v45 = vld [vmem:[%s1873_s1 + $0x238] sm:$0xff]  }
  0x28   :  { %1281 = vmatprep.subr.bf16.mxu0 %v1419_v48  ;;  %v25_v48 = vld [vmem:[%s1872_s0 + $0x48] sm:$0xff] }
  0x29   :  { %1302 = vmatpush3.bf16.msra.mxu1 %v1418_v47  ;;  %v1474_v47 = vld [vmem:[%s1873_s1 + $0x2b8] sm:$0xff]  }
  0x2a   :  { %1303 = vmatprep.subr.bf16.mxu1 %v1421_v50  ;;  %v24_v50 = vld [vmem:[%s1872_s0 + $0x40] sm:$0xff] }
  0x2b   :  { %1282 = vmatpush3.bf16.msra.mxu0 %v1420_v49  ;;  %v38_v49 = vpack.c.bf16 %v25_v48, %v25_v48 }
  0x2c   :  { %1283 = vmatprep.subr.bf16.mxu0 %v1423_v52  ;;  %v1501_v52 = vmov 0.0  }
  0x2d   :  { %1304 = vmatpush3.bf16.msra.mxu1 %v1422_v51  ;;  %v27_v51 = vld [vmem:[%s1872_s0 + $0x58] sm:$0xff] }
  0x2e   :  { %1305 = vmatprep.subr.bf16.mxu1 %v1425_v54  ;;  %v37_v54 = vpack.c.bf16 %v24_v50, %v24_v50 }
  0x2f   :  { %1284 = vmatpush3.bf16.msra.mxu0 %v1424_v53  ;;  %v26_v53 = vld [vmem:[%s1872_s0 + $0x50] sm:$0xff] }
  0x30   :  { %1285 = vmatprep.subr.bf16.mxu0 %v1427_v56  ;;  %v39_v56 = vpack.c.bf16 %v26_v53, %v26_v53 }
  0x31   :  { %1306 = vmatpush3.bf16.msra.mxu1 %v1426_v55  ;;  %v40_v55 = vpack.c.bf16 %v27_v51, %v27_v51 }
  0x32   :  { %1307 = vmatprep.subr.bf16.mxu1 %v1429_v58 }
  0x33   :  { %1286 = vmatpush3.bf16.msra.mxu0 %v1428_v57  ;;  %v1475_v57 = vld [vmem:[%s1873_s1 + $0x300] sm:$0xff]  }
  0x34   :  { %1287 = vmatprep.subr.bf16.mxu0 %v1431_v60 }
  0x35   :  { %1308 = vmatpush3.bf16.msra.mxu1 %v1430_v59 }
  0x36   :  { %1309 = vmatprep.subr.bf16.mxu1 %v1433_v62 }
  0x37   :  { %1288 = vmatpush3.bf16.msra.mxu0 %v1432_v61 }
  0x38   :  { %1289 = vmatprep.subr.bf16.mxu0 %v1435_v0 }
  0x39   :  { %1310 = vmatpush3.bf16.msra.mxu1 %v1434_v63 }
  0x3a   :  { %1311 = vmatprep.subr.bf16.mxu1 %v1437_v2 }
  0x3b   :  { %1290 = vmatpush3.bf16.msra.mxu0 %v1436_v1 }
  0x3c   :  { %1291 = vmatprep.subr.bf16.mxu0 %v1439_v4 }
  0x3d   :  { %1312 = vmatpush3.bf16.msra.mxu1 %v1438_v3 }
  0x3e   :  { %1313 = vmatprep.subr.bf16.mxu1 %v1441_v6 }
  0x3f   :  { %1292 = vmatpush3.bf16.msra.mxu0 %v1440_v5 }
  0x40   :  { %1321 = vmatprep.subr.bf16.mxu0 %v1443_v12 }
  0x41   :  { %1314 = vmatpush3.bf16.msra.mxu1 %v1442_v7 }
  0x42   :  { %950 = vmatmul.mubr.bf16.vlgmr.msra.gmra.mrb[4].mxu0 %v33_v11  ;;  %1343 = vmatprep.subr.bf16.mxu1 %v1445_v16 }
  0x43   :  { %1322 = vmatpush3.bf16.msra.mxu0 %v1444_v15  ;;  %1029 = vmatprep.mubr.bf16.mxu0 %v38_v49 }
  0x44   :  { %990 = vmatmul.mubr.bf16.vlgmr.msra.gmra.mrb[4].mxu1 %v35_v18  ;;  %1323 = vmatprep.subr.bf16.mxu0 %v1447_v20 }
  0x45   :  { %1344 = vmatpush3.bf16.msra.mxu1 %v1446_v19  ;;  %1069 = vmatprep.mubr.bf16.mxu1 %v40_v55 }
  0x46   :  { %1345 = vmatprep.subr.bf16.mxu1 %v1449_v22 }
  0x47   :  { %1324 = vmatpush3.bf16.msra.mxu0 %v1448_v21 }
  0x48   :  { %1325 = vmatprep.subr.bf16.mxu0 %v1451_v24 }
  0x49   :  { %1346 = vmatpush3.bf16.msra.mxu1 %v1450_v23 }
  0x4a   :  { %1347 = vmatprep.subr.bf16.mxu1 %v1453_v26 }
  0x4b   :  { %1326 = vmatpush3.bf16.msra.mxu0 %v1452_v25 }
  0x4c   :  { %1327 = vmatprep.subr.bf16.mxu0 %v1455_v28 }
  0x4d   :  { %1348 = vmatpush3.bf16.msra.mxu1 %v1454_v27 }
  0x4e   :  { %1349 = vmatprep.subr.bf16.mxu1 %v1457_v30 }
  0x4f   :  { %1328 = vmatpush3.bf16.msra.mxu0 %v1456_v29 }
  0x50   :  { %1329 = vmatprep.subr.bf16.mxu0 %v1459_v32 }
  0x51   :  { %1350 = vmatpush3.bf16.msra.mxu1 %v1458_v31 }
  0x52   :  { %1351 = vmatprep.subr.bf16.mxu1 %v1461_v34 }
  0x53   :  { %1330 = vmatpush3.bf16.msra.mxu0 %v1460_v33 }
  0x54   :  { %1331 = vmatprep.subr.bf16.mxu0 %v1463_v36 }
  0x55   :  { %1352 = vmatpush3.bf16.msra.mxu1 %v1462_v35 }
  0x56   :  { %1353 = vmatprep.subr.bf16.mxu1 %v1465_v38 }
  0x57   :  { %1332 = vmatpush3.bf16.msra.mxu0 %v1464_v37 }
  0x58   :  { %1333 = vmatprep.subr.bf16.mxu0 %v1467_v40 }
  0x59   :  { %1354 = vmatpush3.bf16.msra.mxu1 %v1466_v39 }
  0x5a   :  { %1355 = vmatprep.subr.bf16.mxu1 %v1469_v42 }
  0x5b   :  { %1334 = vmatpush3.bf16.msra.mxu0 %v1468_v41 }
  0x5c   :  { %1335 = vmatprep.subr.bf16.mxu0 %v1471_v44 }
  0x5d   :  { %1356 = vmatpush3.bf16.msra.mxu1 %v1470_v43 }
  0x5e   :  { %1357 = vmatprep.subr.bf16.mxu1 %v1473_v46 }
  0x5f   :  { %1336 = vmatpush3.bf16.msra.mxu0 %v1472_v45 }
  0x60   :  { %1368 = vmatprep.subr.bf16.mxu0 %v1501_v52 }
  0x61   :  { %1358 = vmatpush3.bf16.msra.mxu1 %v1474_v47 }
  0x62   :  { %1030 = vmatmul.mubr.bf16.vlgmr.msra.gmra.mrb[8].mxu0 %v37_v54 }
  0x63   :  { %8 = vsyncpa [#allocation3], 0  ;;  %1369 = vmatpush3.bf16.msra.mxu0 %v1475_v57  ;;  %v1476_v58 = vld [vmem:[%s1873_s1 + $0x308] sm:$0xff]   ;;  %vm1502_vm0 = vmmov 0   ;;  %v28_v59 = vld [vmem:[%s1872_s0 + $0x60] sm:$0xff]  ;;  %vm833_vm1 = vcmask 261120  }
  0x64   :  { %1372 = vmatprep.mubr.msk.bf16.mxu0 %vm1502_vm0, %v1501_v52  ;;  %1070 = vmatmul.mubr.bf16.vlgmr.msra.gmra.mrb[8].mxu1 %v39_v56  ;;  %v41_v60 = vpack.c.bf16 %v28_v59, %v28_v59  ;;  %v1133_v62 = vld [vmem:[%s1874_s2] ss:$0 sm:$0xff]  ;;  %s1503_s0 = smov [#allocation2]   ;;  %vm1117_vm2 = vcmask 80896  }
  0x65   :  { %1370 = vmatprep.subr.bf16.mxu0 %v1501_v52  ;;  %s1125_s1 = sshll.u32 %s1503_s0, 4  ;;  %s1126_s1 = int_to_ptr.vmem [resolvable:$true] %s1125_s1 }
  0x66   :  { %s1477_s2 = scalar_lea.vmem %s1126_s1, 128  ;;  %p1482_p1 = scmp.lt.s32.totalorder %s1126_s1, %s1126_s1 }
  0x67   :  { %1371 = vmatpush3.bf16.msra.mxu0 %v1476_v58  ;;  %p1478_p0 = scmp.ne.s32.totalorder %s1126_s1, %s1477_s2  ;;  %p1483_p2 = scmp.lt.s32.totalorder %s1477_s2, %s1477_s2 }
  0x69   :  { %p1484_p3 = por %p1483_p2, %p1482_p1 }
  0x6a   :  { %1373 = vmatmul.mubr.msk.bf16.vlgmr.msra.gmra.mrb[12].mxu0 %vm833_vm1, %v41_v60 }
  0x6b   :  { %p1485_p4 = pnand %p1484_p3, %p1478_p0 }
  0xf5   :  { %v1249_v61 = vpop.f32.mrb[0].mxu0 }
  0xf6   :  { %v1250_v63 = vpop.f32.mrb[1].mxu0 }
  0xf7   :  { %v1251_v0 = vadd.f32 %v1250_v63, %v1249_v61  ;;  %v1252_v1 = vpop.f32.mrb[2].mxu0  ;;  %v1271_v2 = vpop.f32.mrb[0].mxu1 }
  0xf8   :  { %v1253_v3 = vpop.f32.mrb[3].mxu0  ;;  %v1272_v5 = vpop.f32.mrb[1].mxu1 }
  0xf9   :  { %v872_v4 = vadd.f32 %v1251_v0, %v1133_v62  ;;  %v1273_v6 = vadd.f32 %v1272_v5, %v1271_v2  ;;  %v1274_v7 = vpop.f32.mrb[2].mxu1 }
  0xfa   :  { %v1275_v8 = vpop.f32.mrb[3].mxu1 }
  0xfb   :  { %v912_v9 = vadd.f32 %v1273_v6, %v872_v4 }
 0x115   :  { %v1293_v10 = vpop.f32.mrb[4].mxu0 }
 0x116   :  { %v1294_v11 = vpop.f32.mrb[5].mxu0 }
 0x117   :  { %v1295_v12 = vadd.f32 %v1294_v11, %v1293_v10  ;;  %v1296_v13 = vpop.f32.mrb[6].mxu0  ;;  %v1315_v14 = vpop.f32.mrb[4].mxu1 }
 0x118   :  { %v1297_v15 = vpop.f32.mrb[7].mxu0  ;;  %v1316_v17 = vpop.f32.mrb[5].mxu1 }
 0x119   :  { %v952_v16 = vadd.f32 %v1295_v12, %v912_v9  ;;  %v1317_v18 = vadd.f32 %v1316_v17, %v1315_v14  ;;  %v1318_v19 = vpop.f32.mrb[6].mxu1 }
 0x11a   :  { %v1319_v20 = vpop.f32.mrb[7].mxu1 }
 0x11b   :  { %v992_v21 = vadd.f32 %v1317_v18, %v952_v16 }
 0x135   :  { %v1337_v22 = vpop.f32.mrb[8].mxu0 }
 0x136   :  { %v1338_v23 = vpop.f32.mrb[9].mxu0 }
 0x137   :  { %v1339_v24 = vadd.f32 %v1338_v23, %v1337_v22  ;;  %v1359_v25 = vpop.f32.mrb[8].mxu1  ;;  %v1340_v26 = vpop.f32.mrb[10].mxu0 }
 0x138   :  { %v1360_v27 = vpop.f32.mrb[9].mxu1  ;;  %v1341_v28 = vpop.f32.mrb[11].mxu0 }
 0x139   :  { %v1032_v29 = vadd.f32 %v1339_v24, %v992_v21  ;;  %v1361_v30 = vadd.f32 %v1360_v27, %v1359_v25  ;;  %v1362_v31 = vpop.f32.mrb[10].mxu1 }
 0x13a   :  { %v1363_v32 = vpop.f32.mrb[11].mxu1 }
 0x13b   :  { %v1072_v33 = vadd.f32 %v1361_v30, %v1032_v29 }
 0x13d   :  { %v1111_v34 = vpop.f32.mrb[12].mxu0 }
 0x13e   :  { %v1112_v35 = vadd.f32 %v1111_v34, %v1072_v33  ;;  %v1374_v36 = vpop.f32.mrb[13].mxu0 }
 0x13f   :  { %v1114_v37 = vpop.f32.mrb[14].mxu0 }
 0x140   :  { %v1375_v38 = vpop.f32.mrb[15].mxu0  ;;  %1118 = vst.msk [vmem:[#allocation2] sm:$0xff] %vm1117_vm2, %v1112_v35 }
 0x141   :  { %1488 = shalt.err (!%p1485_p4)
}
 0x142   :  { %s1489_s22 = scalar_lea.hbm %s1875_s3, 128 }
 0x143   :  { %p1490_p5 = scmp.ne.s32.totalorder %s1875_s3, %s1489_s22  ;;  %p1493_p6 = scmp.lt.u32.totalorder %s1489_s22, %s1875_s3 }
 0x145   :  { %p1495_p7 = pnand %p1493_p6, %p1490_p5 }
 0x147   :  { %1498 = shalt.err (!%p1495_p7)
}
 0x148   :  { %1128 = dma.vmem_to_hbm [thread:$0]  %s1126_s1, 128, %s1875_s3, [#allocation3]  }
 0x149   :  { %1499 = dma.done.wait [#allocation3], 128  }
 0x14a   :  { %1500 = vsyncadd [#allocation3], 4294967168 }
 0x14b   :  { %1132 = vsyncpa [#allocation3], 1 }

</bundles_post_ra>
